<compile_context>
chip_gen: v5e
topology: v5e:2x2
jax: 0.10.0
libtpu: 0.0.40
codegen_flags: <defaults>
</compile_context>

<pallas_src>
import math

import jax
import jax.numpy as jnp
from jax.experimental import pallas as pl
from jax.experimental.pallas import tpu as pltpu

IN_FEATURES = 2048   # resnet152 model.fc.in_features
C_MID = 32           # width of the stand-in frozen backbone


def _round_up(x, m):
    return (x + m - 1) // m * m


def _lcm(a, b):
    return a * b // math.gcd(a, b)


# ----------------------------------------------------------------------------
# Kernel 1: frozen backbone stand-in, row-tiled over im2col patch rows.
#   conv-as-matmul (bf16 MXU, f32 acc) + bias + ReLU
#   -> pooled-sum accumulation in VMEM scratch (reduction axis "arbitrary")
#   -> on the last tile: folded (proj ∘ fc_image_half) projection + fused bias.
# Produces img_proj: (B, 1, E_pad) = img_feature @ W_img^T + fc_b.
# ----------------------------------------------------------------------------
def _make_backbone_kernel(TP, P):
    inv_p = 1.0 / float(P)

    def kernel(patch_ref, wc_ref, bc_ref, wcomb_ref, bcomb_ref, out_ref,
               pool_acc):
        # patch_ref: (1, TP, K_pad) bf16   wc_ref: (K_pad, C_MID) bf16
        # bc_ref:    (1, C_MID) f32        wcomb_ref: (C_MID, E_pad) bf16
        # bcomb_ref: (1, E_pad) f32        out_ref: (1, 1, E_pad) f32
        # pool_acc:  (1, C_MID) f32 scratch (per-image pooled sum)
        p = pl.program_id(1)

        @pl.when(p == 0)
        def _():
            pool_acc[...] = jnp.zeros_like(pool_acc)

        conv = jnp.dot(patch_ref[0], wc_ref[...],
                       preferred_element_type=jnp.float32) + bc_ref[...]
        conv = jnp.maximum(conv, 0.0)                          # ReLU (f32 VPU)
        if P % TP != 0:
            # Zero-padded patch rows would otherwise contribute relu(bias).
            rows = jax.lax.broadcasted_iota(jnp.int32, (TP, 1), 0) + p * TP
            conv = jnp.where(rows < P, conv, 0.0)
        pool_acc[...] += jnp.sum(conv, axis=0, keepdims=True)  # XLU reduce

        @pl.when(p == pl.num_programs(1) - 1)
        def _():
            pooled = (pool_acc[...] * inv_p).astype(jnp.bfloat16)  # (1, C_MID)
            out_ref[0] = (jnp.dot(pooled, wcomb_ref[...],
                                  preferred_element_type=jnp.float32)
                          + bcomb_ref[...]).astype(out_ref.dtype)

    return kernel


# ----------------------------------------------------------------------------
# Kernel 2: encoding rows = hidden_rows @ W_hid^T + img_proj_row.
# One tile = TS rows of the collapsed (S*B, H) hidden matrix; the image term
# is a resident (TS, E_pad) block (constant index_map -> one DMA total).
# ----------------------------------------------------------------------------
def _encoder_kernel(hid_ref, whidT_ref, imgt_ref, out_ref):
    # hid_ref: (TS, H) f32   whidT_ref: (H, E_pad) bf16   imgt_ref: (TS, E_pad) f32
    hp = jnp.dot(hid_ref[...].astype(jnp.bfloat16), whidT_ref[...],
                 preferred_element_type=jnp.float32)
    out_ref[...] = (hp + imgt_ref[...]).astype(out_ref.dtype)


# ----------------------------------------------------------------------------
# Glue (plain JAX): im2col, one-time frozen-weight prep, pallas_call wrappers.
# ----------------------------------------------------------------------------
def _im2col_3x3(x):
    """x: (B, C, H, W) NCHW, 3x3 conv, stride 1, pad 1 -> (B, H*W, C*9)."""
    B, C, H, W = x.shape
    xp = jnp.pad(x, ((0, 0), (0, 0), (1, 1), (1, 1)))
    cols = []
    for dy in range(3):
        for dx in range(3):
            cols.append(xp[:, :, dy:dy + H, dx:dx + W])          # (B, C, H, W)
    patches = jnp.stack(cols, axis=-1)                           # (B, C, H, W, 9)
    patches = patches.transpose(0, 2, 3, 1, 4)                   # (B, H, W, C, 9)
    return patches.reshape(B, H * W, C * 9)                      # K = c*9 + dy*3 + dx


def prepare_frozen(params):
    """One-time preprocessing of frozen weights (fold, pad, bf16 cast)."""
    hi = jax.lax.Precision.HIGHEST
    E = params["fc_b"].shape[0]
    E_pad = _round_up(E, 128)
    C = params["conv_w"].shape[1]
    K = C * 9
    K_pad = _round_up(K, 32)

    # Conv weight in im2col order, contraction dim zero-padded.
    wcT = params["conv_w"].reshape(C_MID, K).T                   # (K, C_MID)
    wcT = jnp.pad(wcT, ((0, K_pad - K), (0, 0))).astype(jnp.bfloat16)
    bc = params["conv_b"].reshape(1, C_MID).astype(jnp.float32)

    # Fold proj (C_MID -> 2048) with the fc's image half (2048 -> E).
    # Exact algebra (no nonlinearity in between); reassociates the 2048 sum.
    w_img = params["fc_w"][:, :IN_FEATURES]                      # (E, F)
    w_comb = jnp.dot(params["proj_w"].T, w_img.T, precision=hi)  # (C_MID, E)
    b_comb = jnp.dot(params["proj_b"], w_img.T, precision=hi) + params["fc_b"]
    w_comb = jnp.pad(w_comb, ((0, 0), (0, E_pad - E))).astype(jnp.bfloat16)
    b_comb = jnp.pad(b_comb, (0, E_pad - E)).reshape(1, E_pad).astype(jnp.float32)

    # Hidden half of the fc, lane-padded to 128.
    w_hidT = params["fc_w"][:, IN_FEATURES:].T                   # (H, E)
    w_hidT = jnp.pad(w_hidT, ((0, 0), (0, E_pad - E))).astype(jnp.bfloat16)

    return {"wcT": wcT, "bc": bc, "w_comb": w_comb, "b_comb": b_comb,
            "w_hidT": w_hidT, "E": E, "E_pad": E_pad, "K": K, "K_pad": K_pad}


def image_projection(image, prep):
    """(B, C, H, W) -> img_proj (B, E_pad) = img_feature @ W_img^T + fc_b."""
    B = image.shape[0]
    E_pad, K, K_pad = prep["E_pad"], prep["K"], prep["K_pad"]

    patches = _im2col_3x3(image)                                 # (B, P, K)
    P = patches.shape[1]
    patches = jnp.pad(patches, ((0, 0), (0, 0), (0, K_pad - K)))

    TP = min(1024, _round_up(P, 8))                              # patch-row tile
    P_pad = _round_up(P, TP)
    if P_pad != P:
        patches = jnp.pad(patches, ((0, 0), (0, P_pad - P), (0, 0)))
    patches = patches.astype(jnp.bfloat16)

    out = pl.pallas_call(
        _make_backbone_kernel(TP, P),
        out_shape=jax.ShapeDtypeStruct((B, 1, E_pad), jnp.float32),
        grid_spec=pltpu.PrefetchScalarGridSpec(
            num_scalar_prefetch=0,
            grid=(B, P_pad // TP),
            in_specs=[
                pl.BlockSpec((1, TP, K_pad), lambda b, p: (b, p, 0)),
                pl.BlockSpec((K_pad, C_MID), lambda b, p: (0, 0)),
                pl.BlockSpec((1, C_MID), lambda b, p: (0, 0)),
                pl.BlockSpec((C_MID, E_pad), lambda b, p: (0, 0)),
                pl.BlockSpec((1, E_pad), lambda b, p: (0, 0)),
            ],
            out_specs=pl.BlockSpec((1, 1, E_pad), lambda b, p: (b, 0, 0)),
            scratch_shapes=[pltpu.VMEM((1, C_MID), jnp.float32)],
        ),
        compiler_params=pltpu.CompilerParams(
            dimension_semantics=("parallel", "arbitrary")),
    )(patches, prep["wcT"], prep["bc"], prep["w_comb"], prep["b_comb"])
    return out.reshape(B, E_pad)


def img_encoder_for_rnn(image, hidden_state, params, prep=None):
    """encoding = fc(cat([img_feat.repeat(S,1,1), hidden], dim=2)), (S, B, E)."""
    if prep is None:
        prep = prepare_frozen(params)
    S, B, H = hidden_state.shape
    E, E_pad = prep["E"], prep["E_pad"]

    img_proj = image_projection(image, prep)                     # (B, E_pad) f32

    # Collapse (S, B) into one row axis — no transposes, bigger row tiles.
    N = S * B
    row_align = _lcm(8, B)            # sublane-aligned and a multiple of B
    n_tiles_target = max(2, pl.cdiv(N, 512)) if N > row_align else 1
    TS = _round_up(pl.cdiv(N, n_tiles_target), row_align)
    TS = min(TS, _round_up(N, row_align))
    N_pad = _round_up(N, TS)

    hid2d = hidden_state.reshape(N, H)
    if N_pad != N:
        hid2d = jnp.pad(hid2d, ((0, N_pad - N), (0, 0)))

    # Resident image term: row r of a tile gets img_proj[r % B]; tiles start at
    # multiples of TS (multiple of B), so one pre-tiled (TS, E_pad) block works.
    img_tile = jnp.tile(img_proj, (TS // B, 1))                  # (TS, E_pad)

    out = pl.pallas_call(
        _encoder_kernel,
        out_shape=jax.ShapeDtypeStruct((N_pad, E_pad), jnp.float32),
        grid_spec=pltpu.PrefetchScalarGridSpec(
            num_scalar_prefetch=0,
            grid=(N_pad // TS,),
            in_specs=[
                pl.BlockSpec((TS, H), lambda r: (r, 0)),
                pl.BlockSpec((H, E_pad), lambda r: (0, 0)),
                pl.BlockSpec((TS, E_pad), lambda r: (0, 0)),
            ],
            out_specs=pl.BlockSpec((TS, E_pad), lambda r: (r, 0)),
        ),
        compiler_params=pltpu.CompilerParams(
            dimension_semantics=("parallel",)),
    )(hid2d, prep["w_hidT"], img_tile)

    # Strip row/lane padding; reshape back to the module's (S, B, E) layout.
    return out[:N].reshape(S, B, E_pad)[:, :, :E]


# ----------------------------------------------------------------------------
# Pure-JAX reference (unfolded, full precision) for sanity checking.
# ----------------------------------------------------------------------------
def reference(image, hidden_state, params):
    hi = jax.lax.Precision.HIGHEST
    patches = _im2col_3x3(image)
    conv = jnp.maximum(
        jnp.matmul(patches, params["conv_w"].reshape(C_MID, -1).T, precision=hi)
        + params["conv_b"], 0.0)
    pooled = conv.mean(axis=1)
    feat = jnp.matmul(pooled, params["proj_w"].T, precision=hi) + params["proj_b"]
    S = hidden_state.shape[0]
    img_rep = jnp.broadcast_to(feat[None], (S,) + feat.shape)    # repeat(S, 1, 1)
    all_features = jnp.concatenate([img_rep, hidden_state], axis=2)
    return jnp.matmul(all_features, params["fc_w"].T, precision=hi) + params["fc_b"]


def init_params(key, c_in, hidden_size, embed_size):
    k = jax.random.split(key, 6)
    f32 = jnp.float32
    return {
        # frozen backbone stand-in
        "conv_w": jax.random.normal(k[0], (C_MID, c_in, 3, 3), f32) / jnp.sqrt(9.0 * c_in),
        "conv_b": jax.random.normal(k[1], (C_MID,), f32) * 0.01,
        "proj_w": jax.random.normal(k[2], (IN_FEATURES, C_MID), f32) / jnp.sqrt(1.0 * C_MID),
        "proj_b": jax.random.normal(k[3], (IN_FEATURES,), f32) * 0.01,
        # self.fc = nn.Linear(in_features + hidden_size, embed_size)
        "fc_w": jax.random.normal(k[4], (embed_size, IN_FEATURES + hidden_size), f32)
                / jnp.sqrt(1.0 * (IN_FEATURES + hidden_size)),
        "fc_b": jax.random.normal(k[5], (embed_size,), f32) * 0.01,
    }


if __name__ == "__main__":
    B, C, HW = 2, 3, 16            # image: (2, 3, 16, 16)
    S, HIDDEN, EMBED = 8, 32, 32   # hidden_state: (8, 2, 32), embed_size=32

    key = jax.random.PRNGKey(0)
    k_img, k_hid, k_par = jax.random.split(key, 3)
    image = jax.random.normal(k_img, (B, C, HW, HW), jnp.float32)
    hidden_state = jax.random.normal(k_hid, (S, B, HIDDEN), jnp.float32)
    params = init_params(k_par, C, HIDDEN, EMBED)

    prep = prepare_frozen(params)  # frozen-weight preprocessing: once, not per call

    encoding = jax.block_until_ready(
        img_encoder_for_rnn(image, hidden_state, params, prep))
    ref = jax.block_until_ready(reference(image, hidden_state, params))

    assert encoding.shape == (S, B, EMBED), encoding.shape
    max_err = float(jnp.max(jnp.abs(encoding - ref)))
    assert jnp.allclose(encoding, ref, atol=2e-2, rtol=2e-2), (
        f"mismatch vs reference (max abs err {max_err})")
    print("KERNEL_OK")
</pallas_src>

<mosaic_0001>
module attributes {stable_mosaic.version = 11 : i64} {
  func.func @kernel(%arg0: i32, %arg1: i32, %arg2: memref<1x256x32xbf16, #tpu.memory_space<vmem>>, %arg3: memref<32x32xbf16, #tpu.memory_space<vmem>>, %arg4: memref<1x32xf32, #tpu.memory_space<vmem>>, %arg5: memref<32x128xbf16, #tpu.memory_space<vmem>>, %arg6: memref<1x128xf32, #tpu.memory_space<vmem>>, %arg7: memref<1x1x128xf32, #tpu.memory_space<vmem>>, %arg8: memref<1x32xf32, #tpu.memory_space<vmem>>) attributes {dimension_semantics = [#tpu.dimension_semantics<parallel>, #tpu.dimension_semantics<arbitrary>], iteration_bounds = array<i64: 2, 1>, scalar_prefetch = 0 : i64, scratch_operands = 1 : i64, tpu.core_type = #tpu.core_type<tc>, window_params = [{transform_indices = @transform_0, window_bounds = array<i64: 1, 256, 32>}, {pipeline_mode = #tpu.pipeline_mode<synchronous>, transform_indices = @transform_1, window_bounds = array<i64: 32, 32>}, {pipeline_mode = #tpu.pipeline_mode<synchronous>, transform_indices = @transform_2, window_bounds = array<i64: 1, 32>}, {pipeline_mode = #tpu.pipeline_mode<synchronous>, transform_indices = @transform_3, window_bounds = array<i64: 32, 128>}, {pipeline_mode = #tpu.pipeline_mode<synchronous>, transform_indices = @transform_4, window_bounds = array<i64: 1, 128>}, {transform_indices = @transform_5, window_bounds = array<i64: 1, 1, 128>}]} {
    %c0_i32 = arith.constant 0 : i32
    %0 = arith.cmpi eq, %arg1, %c0_i32 : i32
    %1 = arith.extui %0 : i1 to i32
    %c0_i32_0 = arith.constant 0 : i32
    %2 = arith.cmpi ne, %1, %c0_i32_0 : i32
    scf.if %2 {
      %cst_15 = arith.constant 0.000000e+00 : f32
      %20 = vector.broadcast %cst_15 : f32 to vector<1x32xf32>
      %c0_16 = arith.constant 0 : index
      %c0_17 = arith.constant 0 : index
      %21 = vector.load %arg8[%c0_16, %c0_17] : memref<1x32xf32, #tpu.memory_space<vmem>>, vector<1x32xf32>
      tpu.vector_store %arg8[%c0_16, %c0_17], %20 {strides = array<i32>} : memref<1x32xf32, #tpu.memory_space<vmem>>, vector<1x32xf32>,
    } else {
    }
    %c0 = arith.constant 0 : index
    %c0_1 = arith.constant 0 : index
    %c0_2 = arith.constant 0 : index
    %3 = vector.load %arg2[%c0, %c0_1, %c0_2] : memref<1x256x32xbf16, #tpu.memory_space<vmem>>, vector<1x256x32xbf16>
    %4 = vector.shape_cast %3 : vector<1x256x32xbf16> to vector<256x32xbf16>
    %c0_3 = arith.constant 0 : index
    %c0_4 = arith.constant 0 : index
    %5 = vector.load %arg3[%c0_3, %c0_4] : memref<32x32xbf16, #tpu.memory_space<vmem>>, vector<32x32xbf16>
    %cst = arith.constant dense<0.000000e+00> : vector<256x32xf32>
    %6 = tpu.matmul %4, %5, %cst {dimension_numbers = #tpu.dot_dimension_numbers<[1], [0], [0], [1], [0, 0, 1, 1], [], []>} : vector<256x32xbf16>, vector<32x32xbf16>, vector<256x32xf32> -> vector<256x32xf32>
    %c0_5 = arith.constant 0 : index
    %c0_6 = arith.constant 0 : index
    %7 = vector.load %arg4[%c0_5, %c0_6] : memref<1x32xf32, #tpu.memory_space<vmem>>, vector<1x32xf32>
    %8 = vector.broadcast %7 : vector<1x32xf32> to vector<256x32xf32>
    %9 = arith.addf %6, %8 : vector<256x32xf32>
    %cst_7 = arith.constant 0.000000e+00 : f32
    %10 = vector.broadcast %cst_7 : f32 to vector<256x32xf32>
    %11 = arith.maximumf %9, %10 : vector<256x32xf32>
    %c0_8 = arith.constant 0 : index
    %c0_9 = arith.constant 0 : index
    %12 = vector.load %arg8[%c0_8, %c0_9] : memref<1x32xf32, #tpu.memory_space<vmem>>, vector<1x32xf32>
    %cst_10 = arith.constant dense<0.000000e+00> : vector<32xf32>
    %13 = vector.multi_reduction <add>, %11, %cst_10 [0] : vector<256x32xf32> to vector<32xf32>
    %14 = vector.shape_cast %13 : vector<32xf32> to vector<1x32xf32>
    %15 = arith.addf %12, %14 : vector<1x32xf32>
    %c0_11 = arith.constant 0 : index
    %c0_12 = arith.constant 0 : index
    %16 = vector.load %arg8[%c0_11, %c0_12] : memref<1x32xf32, #tpu.memory_space<vmem>>, vector<1x32xf32>
    tpu.vector_store %arg8[%c0_11, %c0_12], %15 {strides = array<i32>} : memref<1x32xf32, #tpu.memory_space<vmem>>, vector<1x32xf32>,
    %c0_i32_13 = arith.constant 0 : i32
    %17 = arith.cmpi eq, %arg1, %c0_i32_13 : i32
    %18 = arith.extui %17 : i1 to i32
    %c0_i32_14 = arith.constant 0 : i32
    %19 = arith.cmpi ne, %18, %c0_i32_14 : i32
    scf.if %19 {
      %c0_15 = arith.constant 0 : index
      %c0_16 = arith.constant 0 : index
      %20 = vector.load %arg8[%c0_15, %c0_16] : memref<1x32xf32, #tpu.memory_space<vmem>>, vector<1x32xf32>
      %cst_17 = arith.constant 3.906250e-03 : f32
      %21 = vector.broadcast %cst_17 : f32 to vector<1x32xf32>
      %22 = arith.mulf %20, %21 : vector<1x32xf32>
      %23 = arith.truncf %22 : vector<1x32xf32> to vector<1x32xbf16>
      %c0_18 = arith.constant 0 : index
      %c0_19 = arith.constant 0 : index
      %24 = vector.load %arg5[%c0_18, %c0_19] : memref<32x128xbf16, #tpu.memory_space<vmem>>, vector<32x128xbf16>
      %cst_20 = arith.constant dense<0.000000e+00> : vector<1x128xf32>
      %25 = tpu.matmul %23, %24, %cst_20 {dimension_numbers = #tpu.dot_dimension_numbers<[1], [0], [0], [1], [0, 0, 1, 1], [], []>} : vector<1x32xbf16>, vector<32x128xbf16>, vector<1x128xf32> -> vector<1x128xf32>
      %c0_21 = arith.constant 0 : index
      %c0_22 = arith.constant 0 : index
      %26 = vector.load %arg6[%c0_21, %c0_22] : memref<1x128xf32, #tpu.memory_space<vmem>>, vector<1x128xf32>
      %27 = arith.addf %25, %26 : vector<1x128xf32>
      %c0_23 = arith.constant 0 : index
      %c0_24 = arith.constant 0 : index
      %c0_25 = arith.constant 0 : index
      %28 = vector.load %arg7[%c0_23, %c0_24, %c0_25] : memref<1x1x128xf32, #tpu.memory_space<vmem>>, vector<1x1x128xf32>
      %29 = vector.shape_cast %28 : vector<1x1x128xf32> to vector<1x128xf32>
      %30 = vector.shape_cast %27 : vector<1x128xf32> to vector<1x1x128xf32>
      tpu.vector_store %arg7[%c0_23, %c0_24, %c0_25], %30 {strides = array<i32>} : memref<1x1x128xf32, #tpu.memory_space<vmem>>, vector<1x1x128xf32>,
    } else {
    }
    return
  }
  func.func @transform_0(%arg0: i32, %arg1: i32) -> (i32, i32, i32) {
    %c0_i32 = arith.constant 0 : i32
    %c0_i32_0 = arith.constant 0 : i32
    return %arg0, %arg1, %c0_i32 : i32, i32, i32
  }
  func.func @transform_1(%arg0: i32, %arg1: i32) -> (i32, i32) {
    %c0_i32 = arith.constant 0 : i32
    %c0_i32_0 = arith.constant 0 : i32
    %c0_i32_1 = arith.constant 0 : i32
    return %c0_i32, %c0_i32_0 : i32, i32
  }
  func.func @transform_2(%arg0: i32, %arg1: i32) -> (i32, i32) {
    %c0_i32 = arith.constant 0 : i32
    %c0_i32_0 = arith.constant 0 : i32
    %c0_i32_1 = arith.constant 0 : i32
    return %c0_i32, %c0_i32_0 : i32, i32
  }
  func.func @transform_3(%arg0: i32, %arg1: i32) -> (i32, i32) {
    %c0_i32 = arith.constant 0 : i32
    %c0_i32_0 = arith.constant 0 : i32
    %c0_i32_1 = arith.constant 0 : i32
    return %c0_i32, %c0_i32_0 : i32, i32
  }
  func.func @transform_4(%arg0: i32, %arg1: i32) -> (i32, i32) {
    %c0_i32 = arith.constant 0 : i32
    %c0_i32_0 = arith.constant 0 : i32
    %c0_i32_1 = arith.constant 0 : i32
    return %c0_i32, %c0_i32_0 : i32, i32
  }
  func.func @transform_5(%arg0: i32, %arg1: i32) -> (i32, i32, i32) {
    %c0_i32 = arith.constant 0 : i32
    %c0_i32_0 = arith.constant 0 : i32
    %c0_i32_1 = arith.constant 0 : i32
    return %arg0, %c0_i32, %c0_i32_0 : i32, i32, i32
  }
}

</mosaic_0001>

<bundles_post_ra>
// kernel: tpu_custom_call.1
= control target key start
LH: loop header
LB: loop body
LE: loop exit
PB: predicated region body
PF: predicated region fallthrough
CT: control target
= control target key end

     0   :  { %10 = vsyncpa [#allocation4], 0  ;;  %s1309_s0 = inlined_call_operand.vmem [shape: bf16[2,256,32], index: 0, kind: input, shape index: {}]   ;;  %s1310_s1 = inlined_call_operand.vmem [shape: bf16[32,32], index: 1, kind: input, shape index: {}]   ;;  %s1311_s2 = inlined_call_operand.vmem [shape: f32[1,32], index: 2, kind: input, shape index: {}]   ;;  %s1312_s3 = inlined_call_operand.vmem [shape: bf16[32,128], index: 3, kind: input, shape index: {}]   ;;  %s1313_s4 = inlined_call_operand.vmem [shape: f32[1,128], index: 4, kind: input, shape index: {}]   ;;  %s1314_s5 = inlined_call_operand.hbm [shape: f32[2,1,128], index: 5, kind: output, shape index: {}]  }
   0x1   :  { %12 = vsyncpa [#allocation4 + $0x1], 0  ;;  %s1055_s18 = smov 0   ;;  %s1057_s19 = smov 0  }
   0x2   :  { %s1059_s20 = smov 0   ;;  %s1061_s21 = smov 0  }
   0x3   :  { %s1063_s22 = smov 0   ;;  %s1065_s23 = smov 0  }
   0x4 LB: > { %s754_s24 = sadd.s32 4294967295, %s1022_s23   ;;  %s755_s25 = sadd.s32 4294967294, %s1022_s23   ;;  %s1022_s23 = sphi %s1065_s23, %s18_s23   ;;  %s1018_s22 = sphi %s1063_s22, %s1321_s22   ;;  %s1014_s21 = sphi %s1061_s21, %s1320_s21   ;;  %s1010_s20 = sphi %s1059_s20, %s1319_s20   ;;  %s1006_s19 = sphi %s1057_s19, %s1318_s19   ;;  %s1002_s18 = sphi %s1055_s18, %s1317_s18  }
   0x5   : > { %s30_s26 = sadd.s32 1, %s1018_s22  ;;  %s149_s27 = sadd.s32 1, %s1010_s20 }
   0x6   : > { %p32_p0 = scmp.ge.s32.totalorder %s30_s26, 2  ;;  %p159_p1 = scmp.ne.s32.totalorder %s1010_s20, %s1006_s19 }
   0x7   : > { %p160_p2 = scmp.eq.s32.totalorder %s754_s24, 1  ;;  %p165_p3 = scmp.ne.s32.totalorder %s1006_s19, %s1002_s18 }
   0x8   : > { %s1323_s26 = smov (%p32_p0, %s30_s26), 0  ;;  %p166_p5 = scmp.eq.s32.totalorder %s755_s25, 1 }
   0x9   : > { %p1095_p4 = por %p160_p2, %p159_p1  ;;  %s146_s29 = ssub.s32 %s1018_s22, %s1323_s26 }
   0xa   : > { %p758_p6 = scmp.ge.s32.totalorder %s1022_s23, 1  ;;  %p147_p7 = scmp.eq.s32.totalorder %s146_s29, 0 }
   0xb   : > { %p1102_p8 = por %p166_p5, %p165_p3  ;;  %p209_p9 = scmp.lt.s32.totalorder %s1022_s23, 3 }
   0xc   : > { %s1108_s6 = scalar_select %p147_p7, %s1010_s20, %s149_s27  }
   0xd   : > { %p210_p10 = pnand %p758_p6, %p209_p9 }
   0xe   : > { %p241_p11 = scmp.lt.s32.totalorder (!%p210_p10), %s1014_s21, 1  ;;  %s238_s7 = sand.u32 (!%p210_p10), 1, %s1006_s19  }
   0xf   : > { %213 = sbr.rel (%p210_p10) target bundleno = 437 (0x1b5), region = 40  ;;  %s681_s10 = scalar_lea.hbm (!%p210_p10), %s1314_s5, %s1014_s21 }
  0x10   : > { %s239_s13 = scalar_lea.vmem (!%p210_p10), [#allocation3], %s238_s7  ;;  %s673_s16 = scalar_lea.sflag (!%p210_p10), [#allocation4], %s238_s7 }
  0x11   : > { %s683_s14 = sshll.u32 (!%p210_p10), %s239_s13, 4  ;;  %s964_s27 = scalar_lea.hbm (!%p210_p10), %s1314_s5, 2  ;;  %s684_s14 = int_to_ptr.vmem [resolvable:$true] %s683_s14 }
  0x14   : > { %v878_v0 = vld [vmem:[%s1310_s1 + $0x8] sm:$0xff]  ;;  %v877_v1 = vld [vmem:[%s1310_s1] sm:$0xff]  ;;  %s242_s11 = scalar_select %p241_p11, %s1014_s21, 1  ;;  %vm389_vm0 = vcmask 261120   ;;  %vm255_vm1 = vcmask 253952  }
  0x15   : > { %444 = vmatpush.bf16.msra.mxu0 %v878_v0  ;;  %882 = vmatpush.bf16.msra.mxu2 %v878_v0  ;;  %v1174_v33 = vld [vmem:[%s1311_s2] ss:$0 sm:$0xff] }
  0x16   : > { %883 = vmatpush.bf16.msra.mxu3 %v878_v0  ;;  %881 = vmatpush.bf16.msra.mxu1 %v878_v0  ;;  %s860_s12 = sshll.u32 %s242_s11, 7 }
  0x17   : > { %s1121_s15 = scalar_lea.vmem %s1309_s0, %s860_s12 }
  0x18   : > { %v861_v2 = vld [vmem:[%s1121_s15] sm:$0xff]  ;;  %v867_v3 = vld [vmem:[%s1121_s15 + $0x30] sm:$0xff]  ;;  %v872_v4 = vld [vmem:[%s1121_s15 + $0x58] sm:$0xff] }
  0x19   : > { %445 = vmatpush.bf16.msra.mxu0 %v877_v1  ;;  %885 = vmatpush.bf16.msra.mxu2 %v877_v1  ;;  %v862_v5 = vld [vmem:[%s1121_s15 + $0x8] sm:$0xff]  ;;  %v868_v6 = vld [vmem:[%s1121_s15 + $0x38] sm:$0xff]  ;;  %v873_v7 = vld [vmem:[%s1121_s15 + $0x60] sm:$0xff] }
  0x1a   : > { %886 = vmatpush.bf16.msra.mxu3 %v877_v1  ;;  %884 = vmatpush.bf16.msra.mxu1 %v877_v1  ;;  %v866_v8 = vld [vmem:[%s1121_s15 + $0x28] sm:$0xff]  ;;  %v863_v9 = vld [vmem:[%s1121_s15 + $0x10] sm:$0xff]  ;;  %v869_v10 = vld [vmem:[%s1121_s15 + $0x40] sm:$0xff] }
  0x1b   : > { %v874_v11 = vld [vmem:[%s1121_s15 + $0x68] sm:$0xff]  ;;  %v864_v12 = vld [vmem:[%s1121_s15 + $0x18] sm:$0xff]  ;;  %v875_v14 = vld [vmem:[%s1121_s15 + $0x70] sm:$0xff] }
  0x1c   : > { %833 = vmatmul.msk.bf16.vlgmr.msra.gmra.mxu0 %vm389_vm0, %v861_v2  ;;  %839 = vmatmul.msk.bf16.vlgmr.msra.gmra.mxu2 %vm389_vm0, %v867_v3  ;;  %v870_v13 = vld [vmem:[%s1121_s15 + $0x48] sm:$0xff]  ;;  %v865_v15 = vld [vmem:[%s1121_s15 + $0x20] sm:$0xff]  ;;  %v871_v16 = vld [vmem:[%s1121_s15 + $0x50] sm:$0xff] }
  0x1d   : > { %844 = vmatmul.msk.bf16.vlgmr.msra.gmra.mxu3 %vm389_vm0, %v872_v4  ;;  %838 = vmatmul.msk.bf16.vlgmr.msra.gmra.mxu1 %vm389_vm0, %v866_v8  ;;  %v876_v17 = vld [vmem:[%s1121_s15 + $0x78] sm:$0xff]  ;;  %s685_s15 = sshll.u32 %s681_s10, 4  ;;  %s686_s15 = int_to_ptr.hbm [resolvable:$true] %s685_s15 }
  0x1e   : > { %s958_s17 = sshra.s32 %s686_s15, 4  ;;  %s959_s17 = int_to_ptr.hbm [resolvable:$true] %s958_s17 }
  0x1f   : > { %s960_s24 = scalar_lea.hbm %s959_s17, 1  ;;  %p965_p1 = scmp.lt.s32.totalorder %s959_s17, %s1314_s5 }
  0x20   : > { %p961_p12 = scmp.ne.s32.totalorder %s959_s17, %s960_s24  ;;  %p966_p2 = scmp.lt.s32.totalorder %s964_s27, %s960_s24 }
  0x22   : > { %p962_p13 = pnand %p961_p12, %p1095_p4  ;;  %p967_p3 = por %p966_p2, %p965_p1 }
  0x24   : > { %p963_p0 = pneg %p962_p13 }
  0x26   : > { %p968_p5 = pnand %p967_p3, %p963_p0 }
  0x2c   : > { %834 = vmatmul.msk.bf16.gmra.mxu0 %vm389_vm0, %v862_v5  ;;  %840 = vmatmul.msk.bf16.gmra.mxu2 %vm389_vm0, %v868_v6 }
  0x2d   : > { %845 = vmatmul.msk.bf16.gmra.mxu3 %vm389_vm0, %v873_v7 }
  0x3c   : > { %835 = vmatmul.msk.bf16.gmra.mxu0 %vm389_vm0, %v863_v9  ;;  %841 = vmatmul.msk.bf16.gmra.mxu2 %vm389_vm0, %v869_v10 }
  0x3d   : > { %846 = vmatmul.msk.bf16.gmra.mxu3 %vm389_vm0, %v874_v11 }
  0x4c   : > { %836 = vmatmul.msk.bf16.gmra.mxu0 %vm389_vm0, %v864_v12  ;;  %842 = vmatmul.msk.bf16.gmra.mxu2 %vm389_vm0, %v870_v13 }
  0x4d   : > { %847 = vmatmul.msk.bf16.gmra.mxu3 %vm389_vm0, %v875_v14 }
  0x5c   : > { %837 = vmatmul.msk.bf16.gmra.mxu0 %vm389_vm0, %v865_v15  ;;  %843 = vmatmul.msk.bf16.gmra.mxu2 %vm389_vm0, %v871_v16 }
  0x5d   : > { %848 = vmatmul.msk.bf16.gmra.mxu3 %vm389_vm0, %v876_v17 }
  0x99   : > { %v447_v18 = vpop.f32.mrf.mxu0 }
  0x9a   : > { %v448_v37 = vadd.f32 %v1174_v33, %v447_v18  ;;  %v472_v48 = vpop.f32.mrf.mxu1 }
  0x9b   : > { %v473_v11 = vadd.f32 %v1174_v33, %v472_v48 }
  0x9c   : > { %v527_v42 = vmax.f32 %v448_v37, 0.0 }
  0x9e   : > { %v560_v51 = vsel %vm389_vm0, %v527_v42, 0.0 }
  0x9f   : > { %v1155_v19 = vpop.f32.mrf.mxu2 }
  0xa0   : > { %v1159_v23 = vpop.f32.mrf.mxu3  ;;  %v478_v18 = vadd.f32 %v1174_v33, %v1155_v19 }
  0xa1   : > { %v449_v20 = vpop.f32.mrf.mxu0 }
  0xa2   : > { %v450_v36 = vadd.f32 %v1174_v33, %v449_v20  ;;  %v474_v6 = vpop.f32.mrf.mxu1  ;;  %v537_v20 = vmax.f32 %v473_v11, 0.0  ;;  %v539_v37 = vmax.f32 %v478_v18, 0.0 }
  0xa3   : > { %v475_v15 = vadd.f32 %v1174_v33, %v474_v6 }
  0xa4   : > { %v528_v39 = vmax.f32 %v450_v36, 0.0 }
  0xa6   : > { %v561_v45 = vsel %vm389_vm0, %v528_v39, 0.0  ;;  %v579_v39 = vsel %vm389_vm0, %v537_v20, 0.0 }
  0xa7   : > { %v1157_v21 = vpop.f32.mrf.mxu2  ;;  %v562_v55 = vadd.f32 %v561_v45, %v560_v51  ;;  %v583_v45 = vsel %vm389_vm0, %v539_v37, 0.0 }
  0xa8   : > { %v1163_v26 = vpop.f32.mrf.mxu3 }
  0xa9   : > { %v452_v22 = vpop.f32.mrf.mxu0 }
  0xaa   : > { %v453_v38 = vadd.f32 %v1174_v33, %v452_v22 }
  0xac   : > { %v529_v43 = vmax.f32 %v453_v38, 0.0 }
  0xae   : > { %v563_v52 = vsel %vm389_vm0, %v529_v43, 0.0 }
  0xaf   : > { %v1161_v24 = vpop.f32.mrf.mxu2  ;;  %v564_v59 = vadd.f32 %v563_v52, %v562_v55 }
  0xb0   : > { %v1167_v29 = vpop.f32.mrf.mxu3  ;;  %v483_v38 = vadd.f32 %v1174_v33, %v1161_v24 }
  0xb1   : > { %v454_v25 = vpop.f32.mrf.mxu0 }
  0xb2   : > { %v455_v40 = vadd.f32 %v1174_v33, %v454_v25 }
  0xb4   : > { %v530_v46 = vmax.f32 %v455_v40, 0.0 }
  0xb6   : > { %v565_v56 = vsel %vm389_vm0, %v530_v46, 0.0  ;;  %v541_v46 = vmax.f32 %v483_v38, 0.0 }
  0xb7   : > { %v1165_v27 = vpop.f32.mrf.mxu2  ;;  %v566_v0 = vadd.f32 %v565_v56, %v564_v59  ;;  %v1024_v59 = vmov 0.0  }
  0xb8   : > { %v1178_v35 = vpop.f32.mrf.mxu3  ;;  %v485_v43 = vadd.f32 %v1174_v33, %v1165_v27  ;;  %256 = vst.msk [vmem:[#allocation2] sm:$0x1] %vm255_vm1, %v1024_v59 }
  0xb9   : > { %v457_v28 = vpop.f32.mrf.mxu0  ;;  %v510_v20 = vadd.f32 %v1174_v33, %v1178_v35  ;;  %v880_v35 = vld [vmem:[%s1312_s3 + $0x8] sm:$0xff] }
  0xba   : > { %v458_v44 = vadd.f32 %v1174_v33, %v457_v28  ;;  %v480_v28 = vadd.f32 %v1174_v33, %v1157_v21  ;;  %v542_v51 = vmax.f32 %v485_v43, 0.0  ;;  %664 = vmatpush.bf16.msrb.mxu1 %v880_v35 }
  0xbc   : > { %v531_v53 = vmax.f32 %v458_v44, 0.0  ;;  %v540_v19 = vmax.f32 %v480_v28, 0.0 }
  0xbe   : > { %v567_v61 = vsel %vm389_vm0, %v531_v53, 0.0  ;;  %v585_v24 = vsel %vm389_vm0, %v540_v19, 0.0 }
  0xbf   : > { %v1169_v31 = vpop.f32.mrf.mxu2  ;;  %v568_v3 = vadd.f32 %v567_v61, %v566_v0 }
  0xc0   : > { %v1187_v50 = vpop.f32.mrf.mxu3 }
  0xc1   : > { %v459_v30 = vpop.f32.mrf.mxu0 }
  0xc2   : > { %v460_v47 = vadd.f32 %v1174_v33, %v459_v30  ;;  %v538_v30 = vmax.f32 %v475_v15, 0.0  ;;  %v508_v15 = vadd.f32 %v1174_v33, %v1167_v29 }
  0xc4   : > { %v532_v57 = vmax.f32 %v460_v47, 0.0  ;;  %v581_v44 = vsel %vm389_vm0, %v538_v30, 0.0  ;;  %v488_v47 = vadd.f32 %v1174_v33, %v1169_v31  ;;  %v551_v28 = vmax.f32 %v508_v15, 0.0 }
  0xc5   : > { %v513_v30 = vadd.f32 %v1174_v33, %v1187_v50  ;;  %v879_v50 = vld [vmem:[%s1312_s3] sm:$0xff] }
  0xc6   : > { %v569_v1 = vsel %vm389_vm0, %v532_v57, 0.0  ;;  %v543_v27 = vmax.f32 %v488_v47, 0.0  ;;  %v589_v57 = vsel %vm389_vm0, %v542_v51, 0.0  ;;  %665 = vmatpush.bf16.msrb.mxu1 %v879_v50 }
  0xc7   : > { %v1176_v34 = vpop.f32.mrf.mxu2  ;;  %v570_v7 = vadd.f32 %v569_v1, %v568_v3 }
  0xc8   : > { %v1198_v9 = vpop.f32.mrf.mxu3  ;;  %v490_v52 = vadd.f32 %v1174_v33, %v1176_v34  ;;  %v591_v34 = vsel %vm389_vm0, %v543_v27, 0.0 }
  0xc9   : > { %v462_v32 = vpop.f32.mrf.mxu0  ;;  %v515_v37 = vadd.f32 %v1174_v33, %v1198_v9 }
  0xca   : > { %v463_v54 = vadd.f32 %v1174_v33, %v462_v32 }
  0xcc   : > { %v533_v62 = vmax.f32 %v463_v54, 0.0  ;;  %v587_v54 = vsel %vm389_vm0, %v541_v46, 0.0 }
  0xce   : > { %v571_v4 = vsel %vm389_vm0, %v533_v62, 0.0 }
  0xcf   : > { %v492_v49 = vpop.f32.mrf.mxu2  ;;  %v572_v12 = vadd.f32 %v571_v4, %v570_v7 }
  0xd0   : > { %v517_v42 = vpop.f32.mrf.mxu3  ;;  %v493_v55 = vadd.f32 %v1174_v33, %v492_v49 }
  0xd1   : > { %v464_v41 = vpop.f32.mrf.mxu0 }
  0xd2   : > { %v465_v58 = vadd.f32 %v1174_v33, %v464_v41 }
  0xd4   : > { %v534_v2 = vmax.f32 %v465_v58, 0.0  ;;  %v544_v58 = vmax.f32 %v490_v52, 0.0 }
  0xd6   : > { %v573_v10 = vsel %vm389_vm0, %v534_v2, 0.0  ;;  %v593_v49 = vsel %vm389_vm0, %v544_v58, 0.0 }
  0xd7   : > { %v494_v8 = vpop.f32.mrf.mxu2  ;;  %v574_v17 = vadd.f32 %v573_v10, %v572_v12  ;;  %v505_v10 = vadd.f32 %v1174_v33, %v1163_v26 }
  0xd8   : > { %v495_v31 = vadd.f32 %v1174_v33, %v494_v8  ;;  %v519_v62 = vpop.f32.mrf.mxu3 }
  0xd9   : > { %v467_v60 = vpop.f32.mrf.mxu0  ;;  %v520_v9 = vadd.f32 %v1174_v33, %v519_v62 }
  0xda   : > { %v468_v63 = vadd.f32 %v1174_v33, %v467_v60  ;;  %v546_v2 = vmax.f32 %v495_v31, 0.0 }
  0xdb   : > { %v556_v51 = vmax.f32 %v520_v9, 0.0 }
  0xdc   : > { %v535_v5 = vmax.f32 %v468_v63, 0.0  ;;  %v545_v63 = vmax.f32 %v493_v55, 0.0  ;;  %v597_v11 = vsel %vm389_vm0, %v546_v2, 0.0 }
  0xde   : > { %v575_v14 = vsel %vm389_vm0, %v535_v5, 0.0  ;;  %v503_v5 = vadd.f32 %v1174_v33, %v1159_v23  ;;  %v595_v6 = vsel %vm389_vm0, %v545_v63, 0.0  ;;  %v550_v23 = vmax.f32 %v505_v10, 0.0 }
  0xdf   : > { %v576_v25 = vadd.f32 %v575_v14, %v574_v17  ;;  %v497_v41 = vpop.f32.mrf.mxu2 }
  0xe0   : > { %v498_v0 = vadd.f32 %v1174_v33, %v497_v41  ;;  %v549_v14 = vmax.f32 %v503_v5, 0.0  ;;  %v522_v18 = vpop.f32.mrf.mxu3  ;;  %v605_v29 = vsel %vm389_vm0, %v550_v23, 0.0  ;;  %v518_v41 = vadd.f32 %v1174_v33, %v517_v42 }
  0xe1   : > { %v469_v13 = vpop.f32.mrf.mxu0 }
  0xe2   : > { %v470_v16 = vadd.f32 %v1174_v33, %v469_v13  ;;  %v547_v7 = vmax.f32 %v498_v0, 0.0  ;;  %v603_v26 = vsel %vm389_vm0, %v549_v14, 0.0  ;;  %v555_v47 = vmax.f32 %v518_v41, 0.0 }
  0xe4   : > { %v536_v22 = vmax.f32 %v470_v16, 0.0  ;;  %v599_v16 = vsel %vm389_vm0, %v547_v7, 0.0 }
  0xe6   : > { %v577_v32 = vsel %vm389_vm0, %v536_v22, 0.0 }
  0xe7   : > { %v578_v36 = vadd.f32 %v577_v32, %v576_v25  ;;  %v499_v61 = vpop.f32.mrf.mxu2 }
  0xe8   : > { %v500_v3 = vadd.f32 %v1174_v33, %v499_v61 }
  0xe9   : > { %v580_v40 = vadd.f32 %v579_v39, %v578_v36  ;;  %v552_v36 = vmax.f32 %v510_v20, 0.0  ;;  %v607_v39 = vsel %vm389_vm0, %v551_v28, 0.0 }
  0xea   : > { %v548_v12 = vmax.f32 %v500_v3, 0.0 }
  0xeb   : > { %v582_v21 = vadd.f32 %v581_v44, %v580_v40  ;;  %v553_v40 = vmax.f32 %v513_v30, 0.0  ;;  %v609_v43 = vsel %vm389_vm0, %v552_v36, 0.0  ;;  %v554_v44 = vmax.f32 %v515_v37, 0.0 }
  0xec   : > { %v601_v22 = vsel %vm389_vm0, %v548_v12, 0.0 }
  0xed   : > { %v584_v48 = vadd.f32 %v583_v45, %v582_v21  ;;  %v524_v45 = vpop.f32.mrf.mxu3  ;;  %v611_v46 = vsel %vm389_vm0, %v553_v40, 0.0  ;;  %v613_v42 = vsel %vm389_vm0, %v554_v44, 0.0 }
  0xee   : > { %v525_v52 = vadd.f32 %v1174_v33, %v524_v45 }
  0xef   : > { %v586_v53 = vadd.f32 %v585_v24, %v584_v48  ;;  %v523_v48 = vadd.f32 %v1174_v33, %v522_v18 }
  0xf1   : > { %v588_v56 = vadd.f32 %v587_v54, %v586_v53  ;;  %v615_v54 = vsel %vm389_vm0, %v555_v47, 0.0  ;;  %v557_v27 = vmax.f32 %v523_v48, 0.0 }
  0xf3   : > { %v590_v60 = vadd.f32 %v589_v57, %v588_v56  ;;  %v617_v56 = vsel %vm389_vm0, %v556_v51, 0.0  ;;  %v558_v57 = vmax.f32 %v525_v52, 0.0  ;;  %v619_v31 = vsel %vm389_vm0, %v557_v27, 0.0 }
  0xf5   : > { %v592_v1 = vadd.f32 %v591_v34, %v590_v60  ;;  %v621_v60 = vsel %vm389_vm0, %v558_v57, 0.0 }
  0xf7   : > { %v594_v4 = vadd.f32 %v593_v49, %v592_v1  ;;  %v559_v1 = vld [vmem:[#allocation2] sm:$0x1] }
  0xf9   : > { %v596_v8 = vadd.f32 %v595_v6, %v594_v4  ;;  %v642_v6 = vld [vmem:[%s1313_s4] sm:$0x1] }
  0xfb   : > { %v598_v13 = vadd.f32 %v597_v11, %v596_v8 }
  0xfd   : > { %v600_v17 = vadd.f32 %v599_v16, %v598_v13 }
  0xff   : > { %v602_v25 = vadd.f32 %v601_v22, %v600_v17 }
 0x101   : > { %v604_v32 = vadd.f32 %v603_v26, %v602_v25 }
 0x103   : > { %v606_v38 = vadd.f32 %v605_v29, %v604_v32 }
 0x105   : > { %v608_v19 = vadd.f32 %v607_v39, %v606_v38 }
 0x107   : > { %v610_v21 = vadd.f32 %v609_v43, %v608_v19 }
 0x109   : > { %v612_v24 = vadd.f32 %v611_v46, %v610_v21 }
 0x10b   : > { %v614_v53 = vadd.f32 %v613_v42, %v612_v24 }
 0x10d   : > { %v616_v55 = vadd.f32 %v615_v54, %v614_v53 }
 0x10f   : > { %v618_v58 = vadd.f32 %v617_v56, %v616_v55 }
 0x111   : > { %v620_v59 = vadd.f32 %v619_v31, %v618_v58 }
 0x113   : > { %v622_v61 = vadd.f32 %v621_v60, %v620_v59 }
 0x115   : > { %v623_v62 = vrot.slane %v622_v61, 4 }
 0x117   : > { %v624_v34 = vadd.f32 %v623_v62, %v622_v61 }
 0x119   : > { %v625_v33 = vrot.slane %v624_v34, 2 }
 0x11b   : > { %v626_v63 = vadd.f32 %v625_v33, %v624_v34 }
 0x11d   : > { %v627_v0 = vrot.slane %v626_v63, 1 }
 0x11f   : > { %v628_v49 = vadd.f32 %v627_v0, %v626_v63 }
 0x121   : > { %v629_v2 = vadd.f32 %v628_v49, %v559_v1 }
 0x123   : > { %631 = vst.msk [vmem:[#allocation2] sm:$0x1] %vm255_vm1, %v629_v2 }
 0x12a   : > { %v635_v3 = vld [vmem:[#allocation2] sm:$0x1] }
 0x12b   : > { %v636_v4 = vmul.f32 0.00390625, %v635_v3 }
 0x12d   : > { %v637_v5 = vpack.c.bf16 %v636_v4, %v636_v4 }
 0x12f   : > { %857 = vmatmul.msk.bf16.vlgmr.msrb.gmra.mxu1 %vm389_vm0, %v637_v5 }
 0x1ac   : > { %v667_v7 = vpop.f32.mrf.mxu1 }
 0x1ad   : > { %v668_v8 = vadd.f32 %v667_v7, %v642_v6 }
 0x1af   : > { %671 = vst [vmem:[%s239_s13] sm:$0x1] %v668_v8 }
 0x1b0   : > { %971 = shalt.err (!%p968_p5)
}
 0x1b1   : > { %887 = dma.vmem_to_hbm [thread:$0]  (%p1095_p4), %s684_s14, 16, %s686_s15, %s673_s16  }
 0x1b4   : > { %v669_v10 = vpop.f32.mrf.mxu1 }
 0x1b5 PF: > { %p893_p6 = scmp.ge.s32.totalorder %s1022_s23, 2  ;;  %s697_s7 = sand.u32 1, %s1002_s18  }
 0x1b6   : > { %s698_s9 = scalar_lea.sflag [#allocation4], %s697_s7 }
 0x1b7   : > { %p890_p7 = pnand %p893_p6, %p1102_p8 }
 0x1b9   : > { %p891_p9 = pneg %p890_p7 }
 0x1bb   : > { %997 = dma.done.wait (%p891_p9), %s698_s9, 16  }
 0x1bc   : > { %999 = vsyncadd (%p891_p9), %s698_s9, 4294967280  ;;  %s18_s23 = sadd.s32 1, %s1022_s23   ;;  %s1317_s18 = smov %s1006_s19 }
 0x1bd   : > { %p15_p10 = scmp.ge.s32.totalorder %s18_s23, 4   ;;  %s1318_s19 = smov %s1010_s20 }
 0x1be   : > { %s1319_s20 = smov %s1108_s6  ;;  %s1320_s21 = smov %s1018_s22 }
 0x1bf   : > { %s1321_s22 = smov %s1323_s26  ;;  %17 = sbr.rel (!%p15_p10) target bundleno = 4 (0x4), region = 83 }
 0x1c4   :  { %703 = vsyncpa [#allocation4], 1 }
 0x1c5   :  { %705 = vsyncpa [#allocation4 + $0x1], 1 }

</bundles_post_ra>
